<compile_context>
chip_gen: v7x
topology: tpu7x:2x2x1
jax: 0.10.0
libtpu: 0.0.40
codegen_flags: <defaults>
</compile_context>

<pallas_src>
import jax
import jax.numpy as jnp
from jax import lax
from jax.experimental import pallas as pl
from jax.experimental.pallas import tpu as pltpu


def _pad8(n: int) -> int:
    return ((n + 7) // 8) * 8


def fix_hidden_mlp_kernel(x_ref, c_ref, out_ref):
    # x: (B, D). c: packed constant slab (rows, D):
    #   rows [0, D)            -> M  = W^T @ RW
    #   rows [r1, r1+D)        -> W^T            (r1 sublane-aligned)
    #   row  r1+D              -> bb = b @ RW
    #   row  r1+D+1            -> b
    D = x_ref.shape[1]
    r1 = _pad8(D)

    x = x_ref[...]
    m = c_ref[0:D, :]
    wt = c_ref[r1:r1 + D, :]
    bb = c_ref[r1 + D:r1 + D + 1, :]
    b = c_ref[r1 + D + 1:r1 + D + 2, :]

    # relu(linear(x) @ RW) == relu(x @ M + bb)   (fold done in the wrapper)
    h = jnp.maximum(jnp.dot(x, m, preferred_element_type=jnp.float32) + bb, 0.0)
    # linear(h) == h @ W^T + b    (same Linear reused, as in the PyTorch module)
    h = jnp.dot(h, wt, preferred_element_type=jnp.float32) + b

    # Reference loop: while sum(|X|) > 1: X /= 2.
    # Halving every element exactly halves sum(|X|) (power-of-2 scaling commutes
    # with fp rounding), so the number of halvings n depends only on
    # s = sum(|h|) and can be read off its exponent bits exactly:
    #   n = 0          if s <= 1
    #   n = e          if s == 2^e exactly (mantissa == 0)
    #   n = e + 1      otherwise, e = unbiased exponent of s
    s = jnp.sum(jnp.abs(h))                          # scalar, s >= 0
    s_v = jnp.full((1, 1), s, dtype=jnp.float32)     # keep bit tricks in vreg domain
    bits = pltpu.bitcast(s_v, jnp.int32)             # sign bit is 0
    expo = (bits >> 23) - 127
    mant = bits & 0x7FFFFF
    n = jnp.where(s_v > 1.0, jnp.where(mant == 0, expo, expo + 1), 0)
    # scale = 2**-n built exactly from its bit pattern (no transcendentals).
    scale = pltpu.bitcast((127 - n) << 23, jnp.float32)   # (1, 1) f32

    # sum(h * 2**-n) == sum(h / 2**n) == reference X.sum() after the loop.
    out_ref[0, 0] = jnp.sum(h * scale)


@jax.jit
def fix_hidden_mlp(x, w, b, rw):
    B, D = x.shape
    wt = w.T                  # nn.Linear right-multiplication form, (in, out)
    m = wt @ rw               # fold linear weight with the fixed random weight
    bb = b @ rw               # fold linear bias with the fixed random weight

    # Pack all constants into one sublane-aligned slab -> single DMA.
    r1 = _pad8(D)
    rows = _pad8(r1 + D + 2)
    slab = jnp.zeros((rows, D), jnp.float32)
    slab = slab.at[0:D, :].set(m)
    slab = slab.at[r1:r1 + D, :].set(wt)
    slab = slab.at[r1 + D, :].set(bb[0])
    slab = slab.at[r1 + D + 1, :].set(b[0])

    out = pl.pallas_call(
        fix_hidden_mlp_kernel,
        out_shape=jax.ShapeDtypeStruct((1, 1), jnp.float32),
        in_specs=[
            pl.BlockSpec((B, D), lambda: (0, 0)),
            pl.BlockSpec((rows, D), lambda: (0, 0)),
        ],
        out_specs=pl.BlockSpec(memory_space=pltpu.SMEM),
    )(x, slab)
    return out[0, 0]


def reference(x, w, b, rw):
    # Mirrors the original PyTorch module exactly (no folding).
    h = x @ w.T + b
    h = jnp.maximum(h @ rw, 0.0)
    h = h @ w.T + b

    def cond(hc):
        return jnp.sum(jnp.abs(hc)) > 1.0

    def body(hc):
        return hc / 2.0

    h = lax.while_loop(cond, body, h)
    return jnp.sum(h)


if __name__ == "__main__":
    key = jax.random.PRNGKey(0)
    k_x, k_w, k_b, k_rw = jax.random.split(key, 4)

    B, D = 2, 20
    x = jax.random.normal(k_x, (B, D), dtype=jnp.float32)

    # nn.Linear(20, 20): weight (out,in), bias (20,), init U(-1/sqrt(20), 1/sqrt(20))
    bound = 1.0 / jnp.sqrt(jnp.float32(D))
    w = jax.random.uniform(k_w, (D, D), dtype=jnp.float32, minval=-bound, maxval=bound)
    b = jax.random.uniform(k_b, (1, D), dtype=jnp.float32, minval=-bound, maxval=bound)
    # torch.rand((20, 20)) fixed random weight ~ U(0, 1)
    rw = jax.random.uniform(k_rw, (D, D), dtype=jnp.float32, minval=0.0, maxval=1.0)

    out = jax.block_until_ready(fix_hidden_mlp(x, w, b, rw))
    ref = jax.block_until_ready(reference(x, w, b, rw))

    # Slightly looser tolerance: the wrapper-side matmul folding reassociates
    # f32 rounding vs the unfused reference (drift ~1e-6 after the 2^-n scaling).
    assert jnp.allclose(out, ref, rtol=1e-4, atol=5e-5), (out, ref)

    print("KERNEL_OK")
</pallas_src>

<mosaic_0001>
module attributes {stable_mosaic.version = 11 : i64} {
  func.func @fix_hidden_mlp_kernel(%arg0: memref<2x20xf32, #tpu.memory_space<vmem>>, %arg1: memref<48x20xf32, #tpu.memory_space<vmem>>, %arg2: memref<1x1xf32, #tpu.memory_space<smem>>) attributes {dimension_semantics = [], scalar_prefetch = 0 : i64, scratch_operands = 0 : i64, tpu.core_type = #tpu.core_type<tc>} {
    %c0 = arith.constant 0 : index
    %c0_0 = arith.constant 0 : index
    %0 = vector.load %arg0[%c0, %c0_0] : memref<2x20xf32, #tpu.memory_space<vmem>>, vector<2x20xf32>
    %c0_1 = arith.constant 0 : index
    %c0_2 = arith.constant 0 : index
    %1 = vector.load %arg1[%c0_1, %c0_2] : memref<48x20xf32, #tpu.memory_space<vmem>>, vector<20x20xf32>
    %c24 = arith.constant 24 : index
    %c0_3 = arith.constant 0 : index
    %2 = vector.load %arg1[%c24, %c0_3] : memref<48x20xf32, #tpu.memory_space<vmem>>, vector<20x20xf32>
    %c44 = arith.constant 44 : index
    %c0_4 = arith.constant 0 : index
    %3 = vector.load %arg1[%c44, %c0_4] : memref<48x20xf32, #tpu.memory_space<vmem>>, vector<1x20xf32>
    %c45 = arith.constant 45 : index
    %c0_5 = arith.constant 0 : index
    %4 = vector.load %arg1[%c45, %c0_5] : memref<48x20xf32, #tpu.memory_space<vmem>>, vector<1x20xf32>
    %cst = arith.constant dense<0.000000e+00> : vector<2x20xf32>
    %5 = tpu.matmul %0, %1, %cst {dimension_numbers = #tpu.dot_dimension_numbers<[1], [0], [0], [1], [0, 0, 1, 1], [], []>} : vector<2x20xf32>, vector<20x20xf32>, vector<2x20xf32> -> vector<2x20xf32>
    %6 = vector.broadcast %3 : vector<1x20xf32> to vector<2x20xf32>
    %7 = arith.addf %5, %6 : vector<2x20xf32>
    %cst_6 = arith.constant 0.000000e+00 : f32
    %8 = vector.broadcast %cst_6 : f32 to vector<2x20xf32>
    %9 = arith.maximumf %7, %8 : vector<2x20xf32>
    %cst_7 = arith.constant dense<0.000000e+00> : vector<2x20xf32>
    %10 = tpu.matmul %9, %2, %cst_7 {dimension_numbers = #tpu.dot_dimension_numbers<[1], [0], [0], [1], [0, 0, 1, 1], [], []>} : vector<2x20xf32>, vector<20x20xf32>, vector<2x20xf32> -> vector<2x20xf32>
    %11 = vector.broadcast %4 : vector<1x20xf32> to vector<2x20xf32>
    %12 = arith.addf %10, %11 : vector<2x20xf32>
    %13 = math.absf %12 : vector<2x20xf32>
    %14 = vector.shape_cast %13 : vector<2x20xf32> to vector<1x2x20xf32>
    %cst_8 = arith.constant dense<0.000000e+00> : vector<1xf32>
    %15 = vector.multi_reduction <add>, %14, %cst_8 [1, 2] : vector<1x2x20xf32> to vector<1xf32>
    %16 = vector.shape_cast %15 : vector<1xf32> to vector<1x1x1xf32>
    %17 = vector.extract %16[0, 0, 0] : f32 from vector<1x1x1xf32>
    %18 = vector.broadcast %17 : f32 to vector<1x1xf32>
    %19 = tpu.bitcast %18 : vector<1x1xf32> -> vector<1x1xi32>
    %c23_i32 = arith.constant 23 : i32
    %20 = vector.broadcast %c23_i32 : i32 to vector<1x1xi32>
    %21 = arith.shrsi %19, %20 : vector<1x1xi32>
    %c127_i32 = arith.constant 127 : i32
    %22 = vector.broadcast %c127_i32 : i32 to vector<1x1xi32>
    %23 = arith.subi %21, %22 : vector<1x1xi32>
    %c8388607_i32 = arith.constant 8388607 : i32
    %24 = vector.broadcast %c8388607_i32 : i32 to vector<1x1xi32>
    %25 = arith.andi %19, %24 : vector<1x1xi32>
    %cst_9 = arith.constant 1.000000e+00 : f32
    %26 = vector.broadcast %cst_9 : f32 to vector<1x1xf32>
    %27 = arith.cmpf ogt, %18, %26 : vector<1x1xf32>
    %c0_i32 = arith.constant 0 : i32
    %28 = vector.broadcast %c0_i32 : i32 to vector<1x1xi32>
    %29 = arith.cmpi eq, %25, %28 : vector<1x1xi32>
    %c1_i32 = arith.constant 1 : i32
    %30 = vector.broadcast %c1_i32 : i32 to vector<1x1xi32>
    %31 = arith.addi %23, %30 : vector<1x1xi32>
    %32 = arith.select %29, %23, %31 : vector<1x1xi1>, vector<1x1xi32>
    %c0_i32_10 = arith.constant 0 : i32
    %33 = vector.broadcast %c0_i32_10 : i32 to vector<1x1xi32>
    %34 = arith.select %27, %32, %33 : vector<1x1xi1>, vector<1x1xi32>
    %c127_i32_11 = arith.constant 127 : i32
    %35 = vector.broadcast %c127_i32_11 : i32 to vector<1x1xi32>
    %36 = arith.subi %35, %34 : vector<1x1xi32>
    %c23_i32_12 = arith.constant 23 : i32
    %37 = vector.broadcast %c23_i32_12 : i32 to vector<1x1xi32>
    %38 = arith.shli %36, %37 : vector<1x1xi32>
    %39 = tpu.bitcast %38 : vector<1x1xi32> -> vector<1x1xf32>
    %40 = vector.broadcast %39 : vector<1x1xf32> to vector<2x20xf32>
    %41 = arith.mulf %12, %40 : vector<2x20xf32>
    %42 = vector.shape_cast %41 : vector<2x20xf32> to vector<1x2x20xf32>
    %cst_13 = arith.constant dense<0.000000e+00> : vector<1xf32>
    %43 = vector.multi_reduction <add>, %42, %cst_13 [1, 2] : vector<1x2x20xf32> to vector<1xf32>
    %44 = vector.shape_cast %43 : vector<1xf32> to vector<1x1x1xf32>
    %45 = vector.extract %44[0, 0, 0] : f32 from vector<1x1x1xf32>
    %c0_14 = arith.constant 0 : index
    %c0_15 = arith.constant 0 : index
    %46 = memref.load %arg2[%c0_14, %c0_15] : memref<1x1xf32, #tpu.memory_space<smem>>
    memref.store %45, %arg2[%c0_14, %c0_15] : memref<1x1xf32, #tpu.memory_space<smem>>
    return
  }
}

</mosaic_0001>

<bundles_post_ra>
// kernel: fix_hidden_mlp.1
= control target key start
LH: loop header
LB: loop body
LE: loop exit
PB: predicated region body
PF: predicated region fallthrough
CT: control target
= control target key end

     0   :  { %v294_v2 = vmov 0.0|0.0   ;;  %vm295_vm0 = vmmov 0   ;;  %v296_v4 = vmov 0.0   ;;  %s354_s0 = inlined_call_operand.vmem [shape: f32[2,20], index: 0, kind: input, shape index: {}]   ;;  %s355_s1 = inlined_call_operand.vmem [shape: f32[48,20], index: 1, kind: input, shape index: {}]   ;;  %s356_s2 = inlined_call_operand.hbm [shape: f32[1,1], index: 2, kind: output, shape index: {}]  }
   0x1   :  { %v13_v0 = vld [vmem:[%s355_s1] sm:$0xff]  ;;  %v14_v1 = vld [vmem:[%s355_s1 + $0x8] sm:$0xff]  ;;  %268 = vmatprep.subr.bf16.mxu0 %v294_v2  ;;  %271 = vmatprep.subr.bf16.mxu1 %v294_v2 }
   0x2   :  { %v269_v3 = vpack.c.bf16 %v14_v1, %v13_v0  ;;  %256 = vmatprep.mubr.msk.f32.mxu0 %vm295_vm0, %v296_v4  ;;  %265 = vmatprep.mubr.msk.f32.mxu1 %vm295_vm0, %v296_v4 }
   0x3   :  { %7 = vsyncpa [#allocation3], 0  ;;  %v15_v5 = vld [vmem:[%s355_s1 + $0x10] sm:$0xf]  ;;  %vm29_vm1 = vcmask 1043456   ;;  %vm25_vm2 = vcmask 162816  }
   0x4   :  { %270 = vmatpush3.bf16.msra.mxu0 %v269_v3  ;;  %v12_v6 = vld [vmem:[%s354_s0] sm:$0x3]  ;;  %v16_v7 = vld [vmem:[%s355_s1 + $0x18] sm:$0xff]  ;;  %v18_v10 = vld [vmem:[%s355_s1 + $0x28] sm:$0xf]  ;;  %vm185_vm3 = vcmask 156672  }
   0x5   :  { %254 = vmatprep.subr.mxu0 %v296_v4  ;;  %v17_v8 = vld [vmem:[%s355_s1 + $0x20] sm:$0xff]  ;;  %v235_v11 = vld [vmem:[%s355_s1 + $0x2c] ss:$0 sm:$0xff]  ;;  %v238_v16 = vld [vmem:[%s355_s1 + $0x2d] ss:$0 sm:$0xff]  ;;  %s282_s29 = scalar_lea.hbm %s356_s2, 16 }
   0x6   :  { %v272_v9 = vpack.c.bf16 %v17_v8, %v16_v7  ;;  %p283_p0 = scmp.ne.s32.totalorder %s356_s2, %s282_s29  ;;  %p286_p1 = scmp.lt.u32.totalorder %s282_s29, %s356_s2 }
   0x8   :  { %255 = vmatpush3.msk.msra.mxu0 %vm29_vm1, %v15_v5  ;;  %273 = vmatpush3.bf16.msra.mxu1 %v272_v9  ;;  %p288_p2 = pnand %p286_p1, %p283_p0 }
   0x9   :  { %257 = vmatmul.mubr.msk.f32.vlgmr.msra.gmra.mrb[0].mxu0 %vm25_vm2, %v12_v6  ;;  %263 = vmatprep.subr.mxu1 %v296_v4 }
   0xc   :  { %264 = vmatpush3.msk.msra.mxu1 %vm29_vm1, %v18_v10 }
  0xdc   :  { %v99_v12 = vpop.f32.mrb[0].mxu0 }
  0xdd   :  { %v100_v13 = vadd.f32 %v235_v11, %v99_v12  ;;  %v258_v14 = vpop.f32.mrb[1].mxu0 }
  0xdf   :  { %v103_v15 = vmax.f32 %v100_v13, 0.0 }
  0xe1   :  { %266 = vmatmul.mubr.msk.f32.vlgmr.msra.gmra.mrb[0].mxu1 %vm25_vm2, %v103_v15 }
 0x1b4   :  { %v180_v17 = vpop.f32.mrb[0].mxu1 }
 0x1b5   :  { %v181_v18 = vadd.f32 %v238_v16, %v180_v17  ;;  %v267_v19 = vpop.f32.mrb[1].mxu1 }
 0x1b7   :  { %v184_v20 = vand.u32 2147483647, %v181_v18 }
 0x1b9   :  { %v186_v21 = vsel %vm185_vm3, %v184_v20, 0.0 }
 0x1ba   :  { %187 = vadd.xlane.f32.xlu0 %v186_v21 }
 0x247   :  { %v188_v22 = vpop.xlane.xlu0 %187 }
 0x248   :  { %v189_v23 = vrot.slane %v188_v22, 4 }
 0x24a   :  { %v190_v24 = vadd.f32 %v189_v23, %v188_v22 }
 0x24c   :  { %v191_v25 = vrot.slane %v190_v24, 2 }
 0x24e   :  { %v192_v26 = vadd.f32 %v191_v25, %v190_v24 }
 0x250   :  { %v193_v27 = vrot.slane %v192_v26, 1 }
 0x252   :  { %v194_v28 = vadd.f32 %v193_v27, %v192_v26 }
 0x254   :  { %274 = vpush %v194_v28 }
 0x285   :  { %s275_s26 = spop %274 }
 0x286   :  { %v196_v29 = vstv %s275_s26 }
 0x287   :  { %v198_v30 = vshra.s32 %v196_v29, 23  ;;  %v200_v31 = vand.u32 8388607, %v196_v29  ;;  %vm201_vm5 = vcmp.gt.f32.partialorder %v196_v29, 1.0 }
 0x289   :  { %v241_v32 = vadd.s32 4294967169, %v198_v30  ;;  %vm202_vm4 = vcmp.eq.s32.totalorder %v200_v31, 0 }
 0x28b   :  { %v203_v33 = vadd.s32 1, %v241_v32 }
 0x28d   :  { %v204_v34 = vsel %vm202_vm4, %v241_v32, %v203_v33 }
 0x28e   :  { %v205_v35 = vsel %vm201_vm5, %v204_v34, 0 }
 0x28f   :  { %v206_v36 = vsub.s32 127, %v205_v35 }
 0x291   :  { %v207_v37 = vshll.u32 %v206_v36, 23 }
 0x293   :  { %v209_v38 = vmul.f32 %v207_v37, %v181_v18 }
 0x295   :  { %v210_v39 = vsel %vm185_vm3, %v209_v38, 0.0 }
 0x296   :  { %211 = vadd.xlane.f32.xlu0 %v210_v39 }
 0x323   :  { %v212_v40 = vpop.xlane.xlu0 %211 }
 0x324   :  { %v213_v41 = vrot.slane %v212_v40, 4 }
 0x326   :  { %v214_v42 = vadd.f32 %v213_v41, %v212_v40 }
 0x328   :  { %v215_v43 = vrot.slane %v214_v42, 2 }
 0x32a   :  { %v216_v44 = vadd.f32 %v215_v43, %v214_v42 }
 0x32c   :  { %v217_v45 = vrot.slane %v216_v44, 1 }
 0x32e   :  { %v218_v46 = vadd.f32 %v217_v45, %v216_v44 }
 0x330   :  { %276 = vpush %v218_v46 }
 0x361   :  { %s277_s1 = spop %276 }
 0x362   :  { %221 = sst [smem:[#allocation2]] %s277_s1 }
 0x363   :  { %291 = shalt.err (!%p288_p2)
}
 0x364   :  { %s297_s6 = smov [#allocation2]  }
 0x365   :  { %229 = dma.smem_to_hbm %s297_s6, 16, %s356_s2, [#allocation3]  }
 0x366   :  { %292 = dma.done.wait [#allocation3], 16  }
 0x367   :  { %293 = vsyncadd [#allocation3], 4294967280 }
 0x368   :  { %233 = sfence }
 0x369   :  { %234 = vsyncpa [#allocation3], 1 }

</bundles_post_ra>
